<compile_context>
chip_gen: v6e
topology: v6e:2x2x1
jax: 0.10.0
libtpu: 0.0.40
codegen_flags: <defaults>
</compile_context>

<pallas_src>
import numpy as np

import jax
import jax.numpy as jnp
from jax.experimental import pallas as pl
from jax.experimental.pallas import tpu as pltpu


# ---------------------------------------------------------------------------
# Pallas kernel: the whole EmbeddingNetL2 forward pass for one batch tile.
# ---------------------------------------------------------------------------
def _embeddingnet_l2_kernel(xbig_ref,
                            w1_ref, b1_ref, w2_ref, b2_ref,
                            wfc1_ref, bfc1_ref, wfc2_ref, bfc2_ref,
                            wfc3_ref, bfc3_ref,
                            se1_ref, cp1_ref, g2_ref, se2_ref, cp2_ref, fs_ref,
                            alphas_ref, out_ref):
    f32 = jnp.float32

    def dot(a, b):
        return jnp.dot(a, b, preferred_element_type=f32)

    def prelu(v, a):
        return jnp.where(v >= 0, v, a * v)

    a_c1 = alphas_ref[0]
    a_c2 = alphas_ref[1]
    a_f1 = alphas_ref[2]
    a_f2 = alphas_ref[3]

    # ---- conv1: one banded matmul + bias + PReLU ------------------------------------
    # rows = (b, y) y in [0,24); cols = x*32 + c, x in [0,24)
    c1 = prelu(dot(xbig_ref[...], w1_ref[...]) + b1_ref[...], a_c1)        # (Tb*24, 768)

    # ---- maxpool1 2x2: roll (XLU) + max, then 1 row-selection + 1 col-compaction -----
    vmax1 = jnp.maximum(c1, pltpu.roll(c1, c1.shape[0] - 1, axis=0))       # pair rows
    hmax1 = jnp.maximum(vmax1, pltpu.roll(vmax1, vmax1.shape[1] - 32, axis=1))  # pair x-blocks
    p1 = dot(dot(se1_ref[...], hmax1), cp1_ref[...])                       # (Tb*12, 384)

    # ---- conv2: 5 row-gathers column-concatenated -> ONE K=1920 matmul ---------------
    g = jnp.concatenate([dot(g2_ref[dy], p1) for dy in range(5)], axis=1)  # (Tb*8, 1920)
    c2 = prelu(dot(g, w2_ref[...]) + b2_ref[...], a_c2)                    # (Tb*8, 512)

    # ---- maxpool2 2x2 -----------------------------------------------------------------
    vmax2 = jnp.maximum(c2, pltpu.roll(c2, c2.shape[0] - 1, axis=0))
    hmax2 = jnp.maximum(vmax2, pltpu.roll(vmax2, vmax2.shape[1] - 64, axis=1))
    p2 = dot(dot(se2_ref[...], hmax2), cp2_ref[...])                       # (Tb*4, 256)

    # ---- fc1: regroup the 4 pooled rows per image into 1024 lanes -> ONE matmul -------
    fcin = jnp.concatenate([dot(fs_ref[k], p2) for k in range(4)], axis=1)  # (Tb, 1024)
    h1 = prelu(dot(fcin, wfc1_ref[...]) + bfc1_ref[...], a_f1)             # (Tb, 256)

    # ---- fc2, fc3 (output zero-padded to 128 lanes), L2 normalize ---------------------
    h2 = prelu(dot(h1, wfc2_ref[...]) + bfc2_ref[...], a_f2)               # (Tb, 256)
    logits = dot(h2, wfc3_ref[...]) + bfc3_ref[...]                        # (Tb, 128)
    ss = jnp.sum(logits * logits, axis=1, keepdims=True)
    out_ref[...] = logits * jax.lax.rsqrt(jnp.maximum(ss, 1e-12))


# ---------------------------------------------------------------------------
# One-time probe: pin down pltpu.roll's rotation direction on this hardware so
# the host-built selection / compaction constants match it exactly.
# ---------------------------------------------------------------------------
def _probe_roll_direction():
    def k(x_ref, r_ref, c_ref):
        x = x_ref[...]
        r_ref[...] = pltpu.roll(x, 7, axis=0)     # 8 rows, shift n-1
        c_ref[...] = pltpu.roll(x, 127, axis=1)   # 128 lanes, shift n-1

    x = jnp.arange(8 * 128, dtype=jnp.float32).reshape(8, 128)
    r, c = pl.pallas_call(
        k,
        out_shape=(jax.ShapeDtypeStruct((8, 128), jnp.float32),
                   jax.ShapeDtypeStruct((8, 128), jnp.float32)),
    )(x)
    xn, rn, cn = np.asarray(x), np.asarray(r), np.asarray(c)
    rows_next = bool(rn[0, 0] == xn[1, 0])    # roll(x, n-1, 0)[i] == x[i+1] ?
    lanes_next = bool(cn[0, 0] == xn[0, 1])   # roll(x, n-1, 1)[:, j] == x[:, j+1] ?
    return rows_next, lanes_next


# ---------------------------------------------------------------------------
# Host-side (one-off) packing of the PyTorch-layout weights into the banded /
# stacked layouts the kernel expects.  Pure layout plumbing (numpy).
# ---------------------------------------------------------------------------
def pack_params(p):
    w1 = np.asarray(p["conv1_w"], np.float32)      # (32, 1, 5, 5)
    b1 = np.asarray(p["conv1_b"], np.float32)      # (32,)
    w2 = np.asarray(p["conv2_w"], np.float32)      # (64, 32, 5, 5)
    b2 = np.asarray(p["conv2_b"], np.float32)      # (64,)
    fc1w = np.asarray(p["fc1_w"], np.float32)      # (256, 1024)
    fc1b = np.asarray(p["fc1_b"], np.float32)
    fc2w = np.asarray(p["fc2_w"], np.float32)      # (256, 256)
    fc2b = np.asarray(p["fc2_b"], np.float32)
    fc3w = np.asarray(p["fc3_w"], np.float32)      # (2, 256)
    fc3b = np.asarray(p["fc3_b"], np.float32)

    # conv1 band: rows = dy*28 + x_in, cols = x_out*32 + c
    w1big = np.zeros((5 * 28, 24 * 32), np.float32)
    for dy in range(5):
        for xo in range(24):
            for dx in range(5):
                w1big[dy * 28 + xo + dx, xo * 32:(xo + 1) * 32] = w1[:, 0, dy, dx]
    b1row = np.tile(b1, 24)[None, :]                                   # (1, 768)

    # conv2 stacked band: rows = dy*384 + x*32 + ci, cols = ox*64 + co  (K = 1920)
    w2stack = np.zeros((5 * 12 * 32, 8 * 64), np.float32)
    for dy in range(5):
        for ox in range(8):
            for dx in range(5):
                x = ox + dx
                w2stack[dy * 384 + x * 32: dy * 384 + (x + 1) * 32,
                        ox * 64:(ox + 1) * 64] = w2[:, :, dy, dx].T
    b2row = np.tile(b2, 8)[None, :]                                    # (1, 512)

    # fc1 stacked: row index = py2*256 + px2*64 + co  (PyTorch flatten is co*16 + h*4 + w).
    r = fc1w.reshape(256, 64, 4, 4)                                    # (o, co, h, w)
    wfc1 = np.transpose(r, (2, 3, 1, 0)).reshape(1024, 256)            # (py2*256+px2*64+co, o)
    bf1row = fc1b[None, :]                                             # (1, 256)

    wfc2t = fc2w.T                                                     # (256, 256)
    bf2row = fc2b[None, :]                                             # (1, 256)

    wfc3p = np.zeros((256, 128), np.float32)                           # pad out dim 2 -> 128
    wfc3p[:, :2] = fc3w.T
    bf3row = np.zeros((1, 128), np.float32)
    bf3row[0, :2] = fc3b

    alphas = np.array([p["a_c1"], p["a_c2"], p["a_f1"], p["a_f2"]], np.float32)

    return {
        "w1big": jnp.asarray(w1big), "b1row": jnp.asarray(b1row),
        "w2stack": jnp.asarray(w2stack), "b2row": jnp.asarray(b2row),
        "wfc1": jnp.asarray(wfc1), "bf1row": jnp.asarray(bf1row),
        "wfc2t": jnp.asarray(wfc2t), "bf2row": jnp.asarray(bf2row),
        "wfc3p": jnp.asarray(wfc3p), "bf3row": jnp.asarray(bf3row),
        "alphas": jnp.asarray(alphas),
    }


# ---------------------------------------------------------------------------
# Host-side selection / compaction constants for a fixed per-tile batch Tb.
# rows_next / lanes_next come from the roll-direction probe.
# ---------------------------------------------------------------------------
def pack_selectors(tile_b, rows_next=True, lanes_next=True):
    tb = tile_b
    r_off = 0 if rows_next else 1          # which row of the rolled pair holds the max
    c_off1 = 0 if lanes_next else 32       # pool1: which 32-lane block holds the max
    c_off2 = 0 if lanes_next else 64       # pool2: which 64-lane block holds the max

    # pool1 vertical: pick pooled row (b, yp) from rolled-max row 2*(b*12+yp)+r_off
    se1 = np.zeros((tb * 12, tb * 24), np.float32)
    idx = np.arange(tb * 12)
    se1[idx, 2 * idx + r_off] = 1.0

    # pool2 vertical
    se2 = np.zeros((tb * 4, tb * 8), np.float32)
    idx = np.arange(tb * 4)
    se2[idx, 2 * idx + r_off] = 1.0

    # pool1 horizontal compaction: 768 -> 384 lanes
    cp1 = np.zeros((768, 384), np.float32)
    for xp in range(12):
        for c in range(32):
            cp1[64 * xp + c_off1 + c, 32 * xp + c] = 1.0

    # pool2 horizontal compaction: 512 -> 256 lanes
    cp2 = np.zeros((512, 256), np.float32)
    for xp in range(4):
        for c in range(64):
            cp2[128 * xp + c_off2 + c, 64 * xp + c] = 1.0

    # conv2 row gathers: output row (b, oy) <- p1 row b*12 + oy + dy
    g2 = np.zeros((5, tb * 8, tb * 12), np.float32)
    rr = np.arange(tb * 8)
    for dy in range(5):
        g2[dy, rr, rr + 4 * (rr // 8) + dy] = 1.0

    # fc1 row gathers: output row b <- p2 row 4*b + py2
    fs = np.zeros((4, tb, tb * 4), np.float32)
    bb = np.arange(tb)
    for k in range(4):
        fs[k, bb, 4 * bb + k] = 1.0

    return {"se1": jnp.asarray(se1), "cp1": jnp.asarray(cp1),
            "g2": jnp.asarray(g2), "se2": jnp.asarray(se2),
            "cp2": jnp.asarray(cp2), "fs": jnp.asarray(fs)}


# ---------------------------------------------------------------------------
# Wrapper: input layout plumbing + gridded pallas_call.
# ---------------------------------------------------------------------------
def embedding_net_l2(x, packed, selectors, tile_b):
    """x: (B, 1, 28, 28) float32.  Returns the L2-normalized (B, 2) embedding."""
    assert tile_b % 8 == 0, "tile_b must be a multiple of 8 (sublane group)"
    B = x.shape[0]
    Bp = ((B + tile_b - 1) // tile_b) * tile_b            # pad batch to a tile multiple

    xp = jnp.pad(x[:, 0].astype(jnp.float32), ((0, Bp - B), (0, 0), (0, 0)))   # (Bp,28,28)
    # rows = (b, y_out), cols = dy*28 + x_in  (the conv1 "tall" operand)
    # TODO(synk): the dy-band im2col replicates the input ~5x; build it in-kernel if the
    # input DMA ever shows up at very large batch.
    xcols = jnp.concatenate([xp[:, dy:dy + 24, :] for dy in range(5)], axis=2)  # (Bp,24,140)
    xbig = xcols.reshape(Bp * 24, 5 * 28)

    n_tiles = Bp // tile_b

    def const_spec(a):
        # full-shape block + constant index_map: stays VMEM-resident across grid steps
        return pl.BlockSpec(a.shape, lambda i, nd=a.ndim: (0,) * nd)

    const_args = [packed["w1big"], packed["b1row"],
                  packed["w2stack"], packed["b2row"],
                  packed["wfc1"], packed["bf1row"],
                  packed["wfc2t"], packed["bf2row"],
                  packed["wfc3p"], packed["bf3row"],
                  selectors["se1"], selectors["cp1"], selectors["g2"],
                  selectors["se2"], selectors["cp2"], selectors["fs"]]

    in_specs = ([pl.BlockSpec((tile_b * 24, 140), lambda i: (i, 0))]
                + [const_spec(a) for a in const_args]
                + [pl.BlockSpec(memory_space=pltpu.MemorySpace.SMEM)])

    out = pl.pallas_call(
        _embeddingnet_l2_kernel,
        out_shape=jax.ShapeDtypeStruct((Bp, 128), jnp.float32),
        grid=(n_tiles,),
        in_specs=in_specs,
        out_specs=pl.BlockSpec((tile_b, 128), lambda i: (i, 0)),
        compiler_params=pltpu.CompilerParams(
            dimension_semantics=("parallel",),
            vmem_limit_bytes=48 * 1024 * 1024),
    )(xbig, *const_args, packed["alphas"])

    return out[:B, :2]


# ---------------------------------------------------------------------------
# Pure-JAX reference (mirrors the PyTorch module exactly, NCHW).
# ---------------------------------------------------------------------------
def reference_forward(x, p):
    hp = jax.lax.Precision.HIGHEST

    def prelu(v, a):
        return jnp.where(v >= 0, v, a * v)

    y = jax.lax.conv_general_dilated(
        x, p["conv1_w"], (1, 1), "VALID",
        dimension_numbers=("NCHW", "OIHW", "NCHW"), precision=hp)
    y = y + p["conv1_b"][None, :, None, None]
    y = prelu(y, p["a_c1"])
    y = jax.lax.reduce_window(y, -jnp.inf, jax.lax.max, (1, 1, 2, 2), (1, 1, 2, 2), "VALID")

    y = jax.lax.conv_general_dilated(
        y, p["conv2_w"], (1, 1), "VALID",
        dimension_numbers=("NCHW", "OIHW", "NCHW"), precision=hp)
    y = y + p["conv2_b"][None, :, None, None]
    y = prelu(y, p["a_c2"])
    y = jax.lax.reduce_window(y, -jnp.inf, jax.lax.max, (1, 1, 2, 2), (1, 1, 2, 2), "VALID")

    y = y.reshape(y.shape[0], -1)                                        # NCHW flatten (B, 1024)
    y = prelu(jnp.dot(y, p["fc1_w"].T, precision=hp) + p["fc1_b"], p["a_f1"])
    y = prelu(jnp.dot(y, p["fc2_w"].T, precision=hp) + p["fc2_b"], p["a_f2"])
    y = jnp.dot(y, p["fc3_w"].T, precision=hp) + p["fc3_b"]
    return y / jnp.sqrt(jnp.sum(y * y, axis=1, keepdims=True))


if __name__ == "__main__":
    B = 2
    TILE_B = 8   # small demo tile; use 16 (v5e) / 32 (v6e, v7x) for throughput batches

    key = jax.random.PRNGKey(0)
    ks = jax.random.split(key, 16)

    params = {
        "conv1_w": 0.2 * jax.random.normal(ks[0], (32, 1, 5, 5), jnp.float32),
        "conv1_b": 0.1 * jax.random.normal(ks[1], (32,), jnp.float32),
        "conv2_w": 0.05 * jax.random.normal(ks[2], (64, 32, 5, 5), jnp.float32),
        "conv2_b": 0.1 * jax.random.normal(ks[3], (64,), jnp.float32),
        "fc1_w": 0.03 * jax.random.normal(ks[4], (256, 1024), jnp.float32),
        "fc1_b": 0.1 * jax.random.normal(ks[5], (256,), jnp.float32),
        "fc2_w": 0.06 * jax.random.normal(ks[6], (256, 256), jnp.float32),
        "fc2_b": 0.1 * jax.random.normal(ks[7], (256,), jnp.float32),
        "fc3_w": 0.06 * jax.random.normal(ks[8], (2, 256), jnp.float32),
        "fc3_b": 0.1 * jax.random.normal(ks[9], (2,), jnp.float32),
        # the four independent nn.PReLU() scalars
        "a_c1": 0.25, "a_c2": 0.1, "a_f1": 0.3, "a_f2": 0.2,
    }
    x = jax.random.normal(ks[10], (B, 1, 28, 28), jnp.float32)

    rows_next, lanes_next = _probe_roll_direction()
    packed = pack_params(params)
    selectors = pack_selectors(TILE_B, rows_next, lanes_next)

    fwd = jax.jit(lambda xx, pp, ss: embedding_net_l2(xx, pp, ss, TILE_B))
    out = jax.block_until_ready(fwd(x, packed, selectors))

    ref = reference_forward(x, params)
    np.testing.assert_allclose(np.asarray(out), np.asarray(ref), rtol=2e-3, atol=2e-3)
    assert out.shape == (B, 2)
    print("KERNEL_OK")
</pallas_src>

<mosaic_0001>
module attributes {stable_mosaic.version = 11 : i64} {
  func.func @k(%arg0: memref<8x128xf32, #tpu.memory_space<vmem>>, %arg1: memref<8x128xf32, #tpu.memory_space<vmem>>, %arg2: memref<8x128xf32, #tpu.memory_space<vmem>>) attributes {dimension_semantics = [], scalar_prefetch = 0 : i64, scratch_operands = 0 : i64, tpu.core_type = #tpu.core_type<tc>} {
    %c0 = arith.constant 0 : index
    %c0_0 = arith.constant 0 : index
    %0 = vector.load %arg0[%c0, %c0_0] : memref<8x128xf32, #tpu.memory_space<vmem>>, vector<8x128xf32>
    %c7_i32 = arith.constant 7 : i32
    %1 = tpu.dynamic_rotate %0 by %c7_i32 dim 0 : vector<8x128xf32>, i32 -> vector<8x128xf32>
    %c0_1 = arith.constant 0 : index
    %c0_2 = arith.constant 0 : index
    %2 = vector.load %arg1[%c0_1, %c0_2] : memref<8x128xf32, #tpu.memory_space<vmem>>, vector<8x128xf32>
    tpu.vector_store %arg1[%c0_1, %c0_2], %1 {strides = array<i32>} : memref<8x128xf32, #tpu.memory_space<vmem>>, vector<8x128xf32>,
    %c127_i32 = arith.constant 127 : i32
    %3 = tpu.dynamic_rotate %0 by %c127_i32 dim 1 : vector<8x128xf32>, i32 -> vector<8x128xf32>
    %c0_3 = arith.constant 0 : index
    %c0_4 = arith.constant 0 : index
    %4 = vector.load %arg2[%c0_3, %c0_4] : memref<8x128xf32, #tpu.memory_space<vmem>>, vector<8x128xf32>
    tpu.vector_store %arg2[%c0_3, %c0_4], %3 {strides = array<i32>} : memref<8x128xf32, #tpu.memory_space<vmem>>, vector<8x128xf32>,
    return
  }
}

</mosaic_0001>

<bundles_post_ra>
// kernel: tpu_custom_call.1
= control target key start
LH: loop header
LB: loop body
LE: loop exit
PB: predicated region body
PF: predicated region fallthrough
CT: control target
= control target key end

     0   :  { %8 = vsyncpa [#allocation3], 0  ;;  %s157_s0 = inlined_call_operand.hbm [shape: f32[8,128], index: 0, kind: input, shape index: {}]   ;;  %s158_s1 = inlined_call_operand.hbm [shape: f32[8,128], index: 1, kind: output, shape index: {0}]   ;;  %s159_s2 = inlined_call_operand.hbm [shape: f32[8,128], index: 2, kind: output, shape index: {1}]  }
   0x1   :  { %9 = vsyncpa [#allocation4], 0 }
   0x2   :  { %10 = vsyncpa [#allocation7], 0  ;;  %s129_s9 = smov [#allocation2]  }
   0x3   :  { %s17_s10 = sshll.u32 %s129_s9, 4  ;;  %s18_s10 = int_to_ptr.vmem [resolvable:$true] %s17_s10 }
   0x4   :  { %s71_s11 = scalar_lea.vmem %s18_s10, 128  ;;  %p76_p1 = scmp.lt.s32.totalorder %s18_s10, %s18_s10 }
   0x5   :  { %p72_p0 = scmp.ne.s32.totalorder %s18_s10, %s71_s11  ;;  %p77_p2 = scmp.lt.s32.totalorder %s71_s11, %s71_s11 }
   0x7   :  { %p78_p3 = por %p77_p2, %p76_p1 }
   0x9   :  { %p79_p4 = pnand %p78_p3, %p72_p0 }
   0xb   :  { %82 = shalt.err (!%p79_p4)
}
   0xc   :  { %20 = dma.hbm_to_vmem [thread:$0]  %s157_s0, 128, %s18_s10, [#allocation3]  }
   0xd   :  { %123 = dma.done.wait [#allocation3], 128  }
   0xe   :  { %124 = vsyncadd [#allocation3], 4294967168  ;;  %s130_s14 = smov [#allocation5]   ;;  %v24_v0 = vld [vmem:[#allocation2] sm:$0xff]  ;;  %s131_s16 = smov 127  }
   0xf   :  { %s36_s15 = sshll.u32 %s130_s14, 4  ;;  %v25_v1 = vrot.slane %v24_v0, 1  ;;  %27 = vrot.lane.b32.xlu0 %v24_v0, %s131_s16  ;;  %s37_s15 = int_to_ptr.vmem [resolvable:$true] %s36_s15 }
  0x10   :  { %s83_s17 = scalar_lea.vmem %s37_s15, 128  ;;  %p88_p6 = scmp.lt.s32.totalorder %s37_s15, %s37_s15 }
  0x11   :  { %26 = vst [vmem:[#allocation5] sm:$0xff] %v25_v1  ;;  %p84_p5 = scmp.ne.s32.totalorder %s37_s15, %s83_s17  ;;  %p89_p7 = scmp.lt.s32.totalorder %s83_s17, %s83_s17 }
  0x13   :  { %p90_p8 = por %p89_p7, %p88_p6 }
  0x15   :  { %p91_p9 = pnand %p90_p8, %p84_p5 }
  0x17   :  { %94 = shalt.err (!%p91_p9)
}
  0x18   :  { %39 = dma.vmem_to_hbm [thread:$0]  %s37_s15, 128, %s158_s1, [#allocation4]  }
  0x19   :  { %s132_s0 = smov [#allocation6]  }
  0x1a   :  { %s46_s20 = sshll.u32 %s132_s0, 4  ;;  %s47_s20 = int_to_ptr.vmem [resolvable:$true] %s46_s20 }
  0x1b   :  { %s103_s21 = scalar_lea.vmem %s47_s20, 128  ;;  %p108_p11 = scmp.lt.s32.totalorder %s47_s20, %s47_s20 }
  0x1c   :  { %p104_p10 = scmp.ne.s32.totalorder %s47_s20, %s103_s21  ;;  %p109_p12 = scmp.lt.s32.totalorder %s103_s21, %s103_s21 }
  0x1e   :  { %p110_p13 = por %p109_p12, %p108_p11 }
  0x20   :  { %p111_p0 = pnand %p110_p13, %p104_p10 }
  0x81   :  { %v28_v2 = vpop.permute.xlu0 %27 }
  0x82   :  { %29 = vst [vmem:[#allocation6] sm:$0xff] %v28_v2 }
  0x83   :  { %114 = shalt.err (!%p111_p0)
}
  0x84   :  { %49 = dma.vmem_to_hbm [thread:$0]  %s47_s20, 128, %s159_s2, [#allocation7]  }
  0x85   :  { %125 = dma.done.wait [#allocation4], 128  }
  0x86   :  { %126 = vsyncadd [#allocation4], 4294967168 }
  0x87   :  { %127 = dma.done.wait [#allocation7], 128  }
  0x88   :  { %128 = vsyncadd [#allocation7], 4294967168 }
  0x89   :  { %56 = vsyncpa [#allocation3], 1 }
  0x8a   :  { %57 = vsyncpa [#allocation4], 1 }
  0x8b   :  { %58 = vsyncpa [#allocation7], 1 }

</bundles_post_ra>
